<compile_context>
chip_gen: v6e
topology: v6e:2x2x1
jax: 0.10.0
libtpu: 0.0.40
codegen_flags: <defaults>
</compile_context>

<pallas_src>
import functools

import jax
import jax.numpy as jnp
from jax.experimental import pallas as pl
from jax.experimental.pallas import tpu as pltpu


def _round_up(x: int, m: int) -> int:
    return ((x + m - 1) // m) * m


# ----------------------------------------------------------------------------
# Pallas kernel: fused LayerNorm + Linear projection + (optional) ReLU
#   h    : [TM, H]   pre-LN hidden tile (row tile of B*S)
#   gamma: [1, H], beta: [1, H]   LayerNorm affine params (VMEM-resident)
#   w    : [H, Pp], b: [1, Pp]    projection weight / bias (VMEM-resident)
#   out  : [TM, Pp] = act( LN(h) @ w + b )
# ----------------------------------------------------------------------------
def _ln_proj_kernel(h_ref, gamma_ref, beta_ref, w_ref, b_ref, o_ref,
                    *, use_act_fn: bool, eps: float):
    # LayerNorm math in f32 (VPU/XLU), regardless of activation dtype.
    h = h_ref[...].astype(jnp.float32)
    mu = jnp.mean(h, axis=-1, keepdims=True)
    var = jnp.mean((h - mu) * (h - mu), axis=-1, keepdims=True)
    xn = (h - mu) * jax.lax.rsqrt(var + eps)
    xn = xn * gamma_ref[...].astype(jnp.float32) + beta_ref[...].astype(jnp.float32)

    # Feed the MXU in the weight's native dtype (bf16-ready); f32 accumulate.
    y = jnp.dot(xn.astype(w_ref.dtype), w_ref[...],
                preferred_element_type=jnp.float32)
    y = y + b_ref[...].astype(jnp.float32)          # epilogue stays in f32
    if use_act_fn:
        y = jnp.maximum(y, 0.0)                     # nn.ReLU
    o_ref[...] = y.astype(o_ref.dtype)


def ln_projection_pallas(h_2d, gamma, beta, weight, bias,
                         *, use_act_fn: bool, eps: float = 1e-5,
                         tm_target: int = 512):
    """Fused LayerNorm + Linear (+ ReLU).

    h_2d:   [N, H]   pre-LayerNorm hidden states
    gamma:  [H], beta: [H]
    weight: [H, P]   (transposed torch nn.Linear weight)
    bias:   [P]
    returns [N, P]
    """
    n, h = h_2d.shape
    p = weight.shape[1]

    # --- lane-dense output: pad P up to a multiple of 128 (zero columns) ----
    p_pad = max(128, _round_up(p, 128))
    if p_pad != p:
        weight = jnp.pad(weight, ((0, 0), (0, p_pad - p)))
        bias = jnp.pad(bias, (0, p_pad - p))

    # --- row tiling: TM multiple of 8, N padded to a multiple of TM ---------
    n8 = _round_up(n, 8)
    tm = min(tm_target, n8)
    n_pad = _round_up(n, tm)
    if n_pad != n:
        h_2d = jnp.pad(h_2d, ((0, n_pad - n), (0, 0)))
    num_tiles = n_pad // tm

    gamma_2d = gamma.reshape(1, h)
    beta_2d = beta.reshape(1, h)
    bias_2d = bias.reshape(1, p_pad)

    itemsize = jnp.dtype(h_2d.dtype).itemsize
    cost = pl.CostEstimate(
        flops=2 * n_pad * h * p_pad + 8 * n_pad * h,
        transcendentals=n_pad,
        bytes_accessed=(n_pad * h + h * p_pad + p_pad + 2 * h
                        + n_pad * p_pad) * itemsize,
    )

    kernel = functools.partial(_ln_proj_kernel, use_act_fn=use_act_fn, eps=eps)
    out_padded = pl.pallas_call(
        kernel,
        out_shape=jax.ShapeDtypeStruct((n_pad, p_pad), h_2d.dtype),
        grid_spec=pltpu.PrefetchScalarGridSpec(
            num_scalar_prefetch=0,
            grid=(num_tiles,),
            in_specs=[
                pl.BlockSpec((tm, h), lambda i: (i, 0)),      # hidden row tile
                pl.BlockSpec((1, h), lambda i: (0, 0)),       # gamma (resident)
                pl.BlockSpec((1, h), lambda i: (0, 0)),       # beta  (resident)
                pl.BlockSpec((h, p_pad), lambda i: (0, 0)),   # W     (resident)
                pl.BlockSpec((1, p_pad), lambda i: (0, 0)),   # bias  (resident)
            ],
            out_specs=pl.BlockSpec((tm, p_pad), lambda i: (i, 0)),
        ),
        compiler_params=pltpu.CompilerParams(
            dimension_semantics=("parallel",),        # rows independent; 2x on v7x
            vmem_limit_bytes=48 * 1024 * 1024,        # > 32 MiB default, < 64 MiB v7x
        ),
        cost_estimate=cost,
    )(h_2d, gamma_2d, beta_2d, weight, bias_2d)

    return out_padded[:n, :p]


# ----------------------------------------------------------------------------
# Synthetic frozen "base model": embeddings only (plain JAX glue).
# Its final LayerNorm is fused into the Pallas kernel above.
# NOTE: attention_mask is NOT applied to the residual stream — HF encoders use
# it only inside attention, which this synthetic stand-in does not have.
# ----------------------------------------------------------------------------
def synthetic_base_model_pre_ln(params, input_ids, attention_mask):
    del attention_mask  # used only by attention in real HF models
    tok_emb = params["tok_emb"][input_ids]               # [B, S, H]
    seq = input_ids.shape[1]
    pos_emb = params["pos_emb"][:seq][None, :, :]        # [1, S, H]
    return tok_emb + pos_emb                              # pre-LayerNorm hidden


# ----------------------------------------------------------------------------
# TextEncoder forward
# ----------------------------------------------------------------------------
def text_encoder_forward(params, token, *, use_act_fn: bool = False):
    hidden = synthetic_base_model_pre_ln(
        params, token["input_ids"], token["attention_mask"])   # [B, S, H]
    b, s, h = hidden.shape
    out_2d = ln_projection_pallas(
        hidden.reshape(b * s, h),
        params["ln_gamma"], params["ln_beta"],
        params["proj_w"], params["proj_b"],
        use_act_fn=use_act_fn)
    return out_2d.reshape(b, s, params["proj_w"].shape[1])


def init_params(key, vocab_size, max_seq, hidden, proj_dim):
    k1, k2, k3, k4 = jax.random.split(key, 4)
    return {
        "tok_emb": jax.random.normal(k1, (vocab_size, hidden), jnp.float32) * 0.02,
        "pos_emb": jax.random.normal(k2, (max_seq, hidden), jnp.float32) * 0.02,
        "ln_gamma": jnp.ones((hidden,), jnp.float32),
        "ln_beta": jnp.zeros((hidden,), jnp.float32),
        # nn.Linear(hidden, proj_dim): weight stored as [H, P] (W^T of torch layout)
        "proj_w": jax.random.normal(k3, (hidden, proj_dim), jnp.float32)
                  * (1.0 / jnp.sqrt(hidden)),
        "proj_b": jax.random.normal(k4, (proj_dim,), jnp.float32) * 0.01,
    }


if __name__ == "__main__":
    B, S, H, P, VOCAB = 2, 8, 32, 32, 64

    key = jax.random.PRNGKey(0)
    kp, ki = jax.random.split(key)
    params = init_params(kp, VOCAB, S, H, P)

    input_ids = jax.random.randint(ki, (B, S), 0, VOCAB, dtype=jnp.int32)
    attention_mask = jnp.ones((B, S), dtype=jnp.int32)
    token = {"input_ids": input_ids, "attention_mask": attention_mask}

    # default module config: use_act_fn=False -> Identity
    out = text_encoder_forward(params, token, use_act_fn=False)
    out = jax.block_until_ready(out)

    # also exercise the ReLU path once
    out_relu = text_encoder_forward(params, token, use_act_fn=True)
    out_relu = jax.block_until_ready(out_relu)

    # pure-JAX reference of the fused LN + projection path
    hid = synthetic_base_model_pre_ln(params, input_ids, attention_mask)
    mu = jnp.mean(hid, axis=-1, keepdims=True)
    var = jnp.mean((hid - mu) ** 2, axis=-1, keepdims=True)
    ln = (hid - mu) * jax.lax.rsqrt(var + 1e-5)
    ln = ln * params["ln_gamma"] + params["ln_beta"]
    ref = ln @ params["proj_w"] + params["proj_b"]

    assert out.shape == (B, S, P)
    assert out_relu.shape == (B, S, P)
    assert bool(jnp.all(out_relu >= 0.0))
    assert bool(jnp.allclose(out, ref, atol=1e-4, rtol=1e-4))
    assert bool(jnp.allclose(out_relu, jnp.maximum(ref, 0.0), atol=1e-4, rtol=1e-4))

    print("KERNEL_OK")
</pallas_src>

<mosaic_0001>
module attributes {stable_mosaic.version = 11 : i64} {
  func.func @_ln_proj_kernel(%arg0: i32, %arg1: memref<16x32xf32, #tpu.memory_space<vmem>>, %arg2: memref<1x32xf32, #tpu.memory_space<vmem>>, %arg3: memref<1x32xf32, #tpu.memory_space<vmem>>, %arg4: memref<32x128xf32, #tpu.memory_space<vmem>>, %arg5: memref<1x128xf32, #tpu.memory_space<vmem>>, %arg6: memref<16x128xf32, #tpu.memory_space<vmem>>) attributes {dimension_semantics = [#tpu.dimension_semantics<parallel>], iteration_bounds = array<i64: 1>, scalar_prefetch = 0 : i64, scratch_operands = 0 : i64, tpu.core_type = #tpu.core_type<tc>, window_params = [{transform_indices = @transform_0, window_bounds = array<i64: 16, 32>}, {pipeline_mode = #tpu.pipeline_mode<synchronous>, transform_indices = @transform_1, window_bounds = array<i64: 1, 32>}, {pipeline_mode = #tpu.pipeline_mode<synchronous>, transform_indices = @transform_2, window_bounds = array<i64: 1, 32>}, {pipeline_mode = #tpu.pipeline_mode<synchronous>, transform_indices = @transform_3, window_bounds = array<i64: 32, 128>}, {pipeline_mode = #tpu.pipeline_mode<synchronous>, transform_indices = @transform_4, window_bounds = array<i64: 1, 128>}, {transform_indices = @transform_5, window_bounds = array<i64: 16, 128>}]} {
    %c0 = arith.constant 0 : index
    %c0_0 = arith.constant 0 : index
    %0 = vector.load %arg1[%c0, %c0_0] : memref<16x32xf32, #tpu.memory_space<vmem>>, vector<16x32xf32>
    %cst = arith.constant dense<0.000000e+00> : vector<16xf32>
    %1 = vector.multi_reduction <add>, %0, %cst [1] : vector<16x32xf32> to vector<16xf32>
    %2 = vector.shape_cast %1 : vector<16xf32> to vector<16x1xf32>
    %cst_1 = arith.constant 3.200000e+01 : f32
    %3 = vector.broadcast %cst_1 : f32 to vector<16x1xf32>
    %4 = arith.divf %2, %3 : vector<16x1xf32>
    %5 = vector.broadcast %4 : vector<16x1xf32> to vector<16x32xf32>
    %6 = arith.subf %0, %5 : vector<16x32xf32>
    %7 = vector.broadcast %4 : vector<16x1xf32> to vector<16x32xf32>
    %8 = arith.subf %0, %7 : vector<16x32xf32>
    %9 = arith.mulf %6, %8 : vector<16x32xf32>
    %cst_2 = arith.constant dense<0.000000e+00> : vector<16xf32>
    %10 = vector.multi_reduction <add>, %9, %cst_2 [1] : vector<16x32xf32> to vector<16xf32>
    %11 = vector.shape_cast %10 : vector<16xf32> to vector<16x1xf32>
    %cst_3 = arith.constant 3.200000e+01 : f32
    %12 = vector.broadcast %cst_3 : f32 to vector<16x1xf32>
    %13 = arith.divf %11, %12 : vector<16x1xf32>
    %14 = vector.broadcast %4 : vector<16x1xf32> to vector<16x32xf32>
    %15 = arith.subf %0, %14 : vector<16x32xf32>
    %cst_4 = arith.constant 9.99999974E-6 : f32
    %16 = vector.broadcast %cst_4 : f32 to vector<16x1xf32>
    %17 = arith.addf %13, %16 : vector<16x1xf32>
    %18 = math.rsqrt %17 : vector<16x1xf32>
    %19 = vector.broadcast %18 : vector<16x1xf32> to vector<16x32xf32>
    %20 = arith.mulf %15, %19 : vector<16x32xf32>
    %c0_5 = arith.constant 0 : index
    %c0_6 = arith.constant 0 : index
    %21 = vector.load %arg2[%c0_5, %c0_6] : memref<1x32xf32, #tpu.memory_space<vmem>>, vector<1x32xf32>
    %22 = vector.broadcast %21 : vector<1x32xf32> to vector<16x32xf32>
    %23 = arith.mulf %20, %22 : vector<16x32xf32>
    %c0_7 = arith.constant 0 : index
    %c0_8 = arith.constant 0 : index
    %24 = vector.load %arg3[%c0_7, %c0_8] : memref<1x32xf32, #tpu.memory_space<vmem>>, vector<1x32xf32>
    %25 = vector.broadcast %24 : vector<1x32xf32> to vector<16x32xf32>
    %26 = arith.addf %23, %25 : vector<16x32xf32>
    %c0_9 = arith.constant 0 : index
    %c0_10 = arith.constant 0 : index
    %27 = vector.load %arg4[%c0_9, %c0_10] : memref<32x128xf32, #tpu.memory_space<vmem>>, vector<32x128xf32>
    %cst_11 = arith.constant dense<0.000000e+00> : vector<16x128xf32>
    %28 = tpu.matmul %26, %27, %cst_11 {dimension_numbers = #tpu.dot_dimension_numbers<[1], [0], [0], [1], [0, 0, 1, 1], [], []>} : vector<16x32xf32>, vector<32x128xf32>, vector<16x128xf32> -> vector<16x128xf32>
    %c0_12 = arith.constant 0 : index
    %c0_13 = arith.constant 0 : index
    %29 = vector.load %arg5[%c0_12, %c0_13] : memref<1x128xf32, #tpu.memory_space<vmem>>, vector<1x128xf32>
    %30 = vector.broadcast %29 : vector<1x128xf32> to vector<16x128xf32>
    %31 = arith.addf %28, %30 : vector<16x128xf32>
    %c0_14 = arith.constant 0 : index
    %c0_15 = arith.constant 0 : index
    %32 = vector.load %arg6[%c0_14, %c0_15] : memref<16x128xf32, #tpu.memory_space<vmem>>, vector<16x128xf32>
    tpu.vector_store %arg6[%c0_14, %c0_15], %31 {strides = array<i32>} : memref<16x128xf32, #tpu.memory_space<vmem>>, vector<16x128xf32>,
    return
  }
  func.func @transform_0(%arg0: i32) -> (i32, i32) {
    %c0_i32 = arith.constant 0 : i32
    %c0_i32_0 = arith.constant 0 : i32
    return %arg0, %c0_i32 : i32, i32
  }
  func.func @transform_1(%arg0: i32) -> (i32, i32) {
    %c0_i32 = arith.constant 0 : i32
    %c0_i32_0 = arith.constant 0 : i32
    %c0_i32_1 = arith.constant 0 : i32
    return %c0_i32, %c0_i32_0 : i32, i32
  }
  func.func @transform_2(%arg0: i32) -> (i32, i32) {
    %c0_i32 = arith.constant 0 : i32
    %c0_i32_0 = arith.constant 0 : i32
    %c0_i32_1 = arith.constant 0 : i32
    return %c0_i32, %c0_i32_0 : i32, i32
  }
  func.func @transform_3(%arg0: i32) -> (i32, i32) {
    %c0_i32 = arith.constant 0 : i32
    %c0_i32_0 = arith.constant 0 : i32
    %c0_i32_1 = arith.constant 0 : i32
    return %c0_i32, %c0_i32_0 : i32, i32
  }
  func.func @transform_4(%arg0: i32) -> (i32, i32) {
    %c0_i32 = arith.constant 0 : i32
    %c0_i32_0 = arith.constant 0 : i32
    %c0_i32_1 = arith.constant 0 : i32
    return %c0_i32, %c0_i32_0 : i32, i32
  }
  func.func @transform_5(%arg0: i32) -> (i32, i32) {
    %c0_i32 = arith.constant 0 : i32
    %c0_i32_0 = arith.constant 0 : i32
    return %arg0, %c0_i32 : i32, i32
  }
}

</mosaic_0001>

<bundles_post_ra>
// kernel: tpu_custom_call.1
= control target key start
LH: loop header
LB: loop body
LE: loop exit
PB: predicated region body
PF: predicated region fallthrough
CT: control target
= control target key end

     0   :  { %10 = vsyncpa [#allocation3], 0  ;;  %s374_s0 = inlined_call_operand.hbm [shape: f32[16,32], index: 0, kind: input, shape index: {}]   ;;  %s375_s1 = inlined_call_operand.vmem [shape: f32[1,32], index: 1, kind: input, shape index: {}]   ;;  %s376_s2 = inlined_call_operand.vmem [shape: f32[1,32], index: 2, kind: input, shape index: {}]   ;;  %s377_s3 = inlined_call_operand.hbm [shape: f32[32,128], index: 3, kind: input, shape index: {}]   ;;  %s378_s4 = inlined_call_operand.vmem [shape: f32[1,128], index: 4, kind: input, shape index: {}]   ;;  %s379_s5 = inlined_call_operand.hbm [shape: f32[16,128], index: 5, kind: output, shape index: {}]  }
   0x1   :  { %11 = vsyncpa [#allocation6], 0 }
   0x2   :  { %12 = vsyncpa [#allocation4], 0  ;;  %s306_s18 = smov [#allocation2]  }
   0x3   :  { %s18_s19 = sshll.u32 %s306_s18, 4  ;;  %s19_s19 = int_to_ptr.vmem [resolvable:$true] %s18_s19 }
   0x4   :  { %s248_s20 = scalar_lea.vmem %s19_s19, 256  ;;  %p253_p1 = scmp.lt.s32.totalorder %s19_s19, %s19_s19 }
   0x5   :  { %p249_p0 = scmp.ne.s32.totalorder %s19_s19, %s248_s20  ;;  %p254_p2 = scmp.lt.s32.totalorder %s248_s20, %s248_s20 }
   0x7   :  { %p255_p3 = por %p254_p2, %p253_p1 }
   0x9   :  { %p256_p4 = pnand %p255_p3, %p249_p0 }
   0xb   :  { %259 = shalt.err (!%p256_p4)
}
   0xc   :  { %s307_s21 = smov 128   ;;  %s308_s22 = smov 8  }
   0xd   :  { %24 = dma.hbm_to_vmem [thread:$0]  %s374_s0, 256, %s19_s19, [#allocation3], %s307_s21, %s307_s21, %s308_s22  }
   0xe   :  { %s309_s25 = smov [#allocation5]  }
   0xf   :  { %s34_s26 = sshll.u32 %s309_s25, 4  ;;  %s35_s26 = int_to_ptr.vmem [resolvable:$true] %s34_s26 }
  0x10   :  { %s268_s27 = scalar_lea.vmem %s35_s26, 512  ;;  %p273_p6 = scmp.lt.s32.totalorder %s35_s26, %s35_s26 }
  0x11   :  { %p269_p5 = scmp.ne.s32.totalorder %s35_s26, %s268_s27  ;;  %p274_p7 = scmp.lt.s32.totalorder %s268_s27, %s268_s27 }
  0x13   :  { %p275_p8 = por %p274_p7, %p273_p6 }
  0x15   :  { %p276_p9 = pnand %p275_p8, %p269_p5 }
  0x17   :  { %279 = shalt.err (!%p276_p9)
}
  0x18   :  { %40 = dma.hbm_to_vmem [thread:$0]  %s377_s3, 512, %s35_s26, [#allocation6], %s307_s21, %s307_s21, %s308_s22  }
  0x19   :  { %300 = dma.done.wait [#allocation3], 256  }
  0x1a   :  { %301 = vsyncadd [#allocation3], 4294967040 }
  0x1b   :  { %302 = dma.done.wait [#allocation6], 512  }
  0x1c   :  { %303 = vsyncadd [#allocation6], 4294966784  ;;  %vm51_vm0 = vcmask 261120   ;;  %v49_v0 = vld [vmem:[#allocation2] sm:$0xff]  ;;  %v50_v1 = vld [vmem:[#allocation2 + $0x8] sm:$0xff] }
  0x1d   :  { %v52_v2 = vsel %vm51_vm0, %v49_v0, 0.0  ;;  %v55_v3 = vsel %vm51_vm0, %v50_v1, 0.0  ;;  %v100_v14 = vld [vmem:[#allocation5 + $0x18] sm:$0xff]  ;;  %v99_v15 = vld [vmem:[#allocation5 + $0x10] sm:$0xff]  ;;  %v98_v16 = vld [vmem:[#allocation5 + $0x8] sm:$0xff] }
  0x1e   :  { %53 = vadd.xlane.f32.xlu0 %v52_v2  ;;  %220 = vmatprep.subr.mxu0 %v100_v14  ;;  %v97_v17 = vld [vmem:[#allocation5] sm:$0xff]  ;;  %v209_v25 = vld [vmem:[%s375_s1] ss:$0 sm:$0xff]  ;;  %s310_s1 = smov [#allocation7]  }
  0x1f   :  { %221 = vmatpush3.msra.mxu0 %v100_v14  ;;  %v210_v27 = vld [vmem:[%s376_s2] ss:$0 sm:$0xff]  ;;  %s196_s9 = sshll.u32 %s310_s1, 4  ;;  %s197_s9 = int_to_ptr.vmem [resolvable:$true] %s196_s9 }
  0x20   :  { %222 = vmatprep.subr.mxu0 %v99_v15  ;;  %v211_v34 = vld [vmem:[%s378_s4] ss:$0 sm:$0xff]  ;;  %s280_s2 = scalar_lea.vmem %s197_s9, 256  ;;  %p285_p11 = scmp.lt.s32.totalorder %s197_s9, %s197_s9 }
  0x21   :  { %223 = vmatpush3.msra.mxu0 %v99_v15  ;;  %p281_p10 = scmp.ne.s32.totalorder %s197_s9, %s280_s2  ;;  %p286_p12 = scmp.lt.s32.totalorder %s280_s2, %s280_s2 }
  0x22   :  { %56 = vadd.xlane.f32.xlu0 %v55_v3  ;;  %224 = vmatprep.subr.mxu0 %v98_v16 }
  0x23   :  { %225 = vmatpush3.msra.mxu0 %v98_v16  ;;  %p287_p13 = por %p286_p12, %p285_p11 }
  0x24   :  { %226 = vmatprep.subr.mxu0 %v97_v17 }
  0x25   :  { %227 = vmatpush3.msra.mxu0 %v97_v17  ;;  %p288_p0 = pnand %p287_p13, %p281_p10 }
  0xa7   :  { %v54_v4 = vpop.xlane.xlu0 %53 }
  0xa8   :  { %v59_v5 = vmul.f32 0.03125, %v54_v4 }
  0xaa   :  { %v61_v6 = vsub.f32 %v49_v0, %v59_v5 }
  0xab   :  { %v57_v7 = vpop.xlane.xlu0 %56 }
  0xac   :  { %v60_v8 = vmul.f32 0.03125, %v57_v7  ;;  %v63_v9 = vmul.f32 %v61_v6, %v61_v6 }
  0xae   :  { %v62_v10 = vsub.f32 %v50_v1, %v60_v8  ;;  %v65_v11 = vsel %vm51_vm0, %v63_v9, 0.0 }
  0xaf   :  { %66 = vadd.xlane.f32.xlu1 %v65_v11 }
  0xb0   :  { %v64_v12 = vmul.f32 %v62_v10, %v62_v10 }
  0xb2   :  { %v68_v13 = vsel %vm51_vm0, %v64_v12, 0.0 }
  0xb3   :  { %69 = vadd.xlane.f32.xlu1 %v68_v13 }
 0x138   :  { %v67_v18 = vpop.xlane.xlu1 %66 }
 0x139   :  { %v71_v19 = vmul.f32 0.03125, %v67_v18 }
 0x13b   :  { %v73_v20 = vadd.f32 1e-05, %v71_v19 }
 0x13c   :  { %v70_v21 = vpop.xlane.xlu1 %69 }
 0x13d   :  { %236 = vrsqrt.f32 %v73_v20  ;;  %v72_v22 = vmul.f32 0.03125, %v70_v21 }
 0x13f   :  { %v74_v23 = vadd.f32 1e-05, %v72_v22 }
 0x141   :  { %238 = vrsqrt.f32 %v74_v23 }
 0x14a   :  { %v237_v24 = vpop.eup %236 }
 0x14b   :  { %v77_v26 = vmul.f32 %v237_v24, %v61_v6 }
 0x14d   :  { %v86_v28 = vmul.f32 %v209_v25, %v77_v26 }
 0x14e   :  { %v239_v29 = vpop.eup %238 }
 0x14f   :  { %v78_v30 = vmul.f32 %v239_v29, %v62_v10  ;;  %v95_v31 = vadd.f32 %v210_v27, %v86_v28 }
 0x151   :  { %v87_v32 = vmul.f32 %v209_v25, %v78_v30  ;;  %228 = vmatprep.mubr.msk.f32.mxu0 %vm51_vm0, %v95_v31 }
 0x153   :  { %v96_v33 = vadd.f32 %v210_v27, %v87_v32 }
 0x155   :  { %229 = vmatmul.mubr.msk.f32.vlgmr.msra.gmra.mxu0 %vm51_vm0, %v96_v33 }
 0x215   :  { %v230_v35 = vpop.f32.mrf.mxu0 }
 0x216   :  { %v186_v36 = vadd.f32 %v230_v35, %v211_v34 }
 0x217   :  { %v180_v37 = vpop.f32.mrf.mxu0 }
 0x218   :  { %190 = vst [vmem:[#allocation7 + $0x8] sm:$0xff] %v186_v36  ;;  %v181_v38 = vadd.f32 %v211_v34, %v180_v37 }
 0x21a   :  { %189 = vst [vmem:[#allocation7] sm:$0xff] %v181_v38 }
 0x21b   :  { %291 = shalt.err (!%p288_p0)
}
 0x21c   :  { %202 = dma.vmem_to_hbm [thread:$0]  %s197_s9, 256, %s379_s5, [#allocation4], %s307_s21, %s307_s21, %s308_s22  }
 0x21d   :  { %304 = dma.done.wait [#allocation4], 256  }
 0x21e   :  { %305 = vsyncadd [#allocation4], 4294967040 }
 0x21f   :  { %206 = vsyncpa [#allocation3], 1 }
 0x220   :  { %207 = vsyncpa [#allocation6], 1 }
 0x221   :  { %208 = vsyncpa [#allocation4], 1 }

</bundles_post_ra>
